<compile_context>
chip_gen: v5e
topology: v5e:2x2
jax: 0.10.0
libtpu: 0.0.40
codegen_flags: <defaults>
</compile_context>

<pallas_src>
import jax
import jax.numpy as jnp
from jax.experimental import pallas as pl
from jax.experimental.pallas import tpu as pltpu

_LANES = 128
_TARGET_BLOCK_BYTES = 1 << 20        # ~1 MiB per block
_SMALL_WHOLE_BLOCK_ELEMS = 1 << 17   # <= 128K elems -> single whole-array block


def _copy_kernel(x_ref, o_ref):
    # Identity copy of the current VMEM tile — the entire "hot path" of View.
    o_ref[...] = x_ref[...]


def _round_up(x: int, m: int) -> int:
    return ((x + m - 1) // m) * m


def _sublane_granularity(dtype) -> int:
    # Packed dtypes occupy 16 (2-byte) / 32 (1-byte) sublane rows per vreg.
    itemsize = jnp.dtype(dtype).itemsize
    return {4: 8, 2: 16, 1: 32}.get(itemsize, 8)


def _tiled_copy(flat: jax.Array) -> jax.Array:
    """Copy a 1-D array (length divisible by 128) via a tiled Pallas kernel."""
    n = flat.shape[0]
    dt = flat.dtype
    itemsize = jnp.dtype(dt).itemsize
    gran = _sublane_granularity(dt)

    rows = n // _LANES
    x2d = flat.reshape(rows, _LANES)          # lane-dense slab, metadata-only

    # ~1 MiB blocks, rounded to the packed-sublane granularity.
    max_rows = max(gran, (_TARGET_BLOCK_BYTES // (_LANES * itemsize)) // gran * gran)
    tile_rows = min(_round_up(rows, gran), max_rows)

    grid = (pl.cdiv(rows, tile_rows),)        # ragged edge handled by Pallas

    out = pl.pallas_call(
        _copy_kernel,
        out_shape=jax.ShapeDtypeStruct((rows, _LANES), dt),
        grid_spec=pltpu.PrefetchScalarGridSpec(
            num_scalar_prefetch=0,
            grid=grid,
            in_specs=[pl.BlockSpec((tile_rows, _LANES), lambda i: (i, 0))],
            out_specs=pl.BlockSpec((tile_rows, _LANES), lambda i: (i, 0)),
        ),
        compiler_params=pltpu.CompilerParams(
            dimension_semantics=("parallel",),   # shards across v7x's 2 TCs
            vmem_limit_bytes=32 << 20,
        ),
    )(x2d)
    return out.reshape(-1)


def _whole_block_copy(flat: jax.Array) -> jax.Array:
    """Single whole-array block copy (full-dims block waives the (8,128) rule)."""
    n = flat.shape[0]
    x2d = flat.reshape(1, n)
    out = pl.pallas_call(
        _copy_kernel,
        out_shape=jax.ShapeDtypeStruct((1, n), flat.dtype),
    )(x2d)
    return out.reshape(-1)


def _pallas_identity_copy(x: jax.Array) -> jax.Array:
    """Copy `x` through a Pallas TPU kernel, returning identical flat data."""
    flat = x.reshape(-1)                      # metadata-only on contiguous input
    n = flat.shape[0]
    gran = _sublane_granularity(flat.dtype)

    if n % _LANES == 0 and (n // _LANES) >= gran:
        # Common case: no pad, no slice, cdiv grid, lane-dense blocks.
        return _tiled_copy(flat)
    if n <= _SMALL_WHOLE_BLOCK_ELEMS:
        # Tiny / awkward sizes: one whole-array block, no grid, no pad.
        return _whole_block_copy(flat)
    # Rare: large and not 128-divisible — minimal pad to a lane multiple.
    # TODO(synk): could split off the <128-element tail into its own tiny copy
    # to avoid the extra pad/slice HBM pass on this (rare) path.
    pad = (-n) % _LANES
    padded = jnp.pad(flat, (0, pad))
    return _tiled_copy(padded)[:n]


def view_forward(x: jax.Array, shape, no_batch: bool = False,
                 force_copy: bool = False) -> jax.Array:
    """JAX/Pallas equivalent of View.forward.

    Default path is metadata-only (exactly like torch .view()).  Set
    `force_copy=True` to route the data through the Pallas identity-copy
    kernel (e.g. to force a physical materialization on-chip).
    """
    target = tuple(shape) if no_batch else (x.shape[0], *tuple(shape))
    if not force_copy:
        return jnp.reshape(x, target)         # zero-cost, like .view()
    copied = _pallas_identity_copy(x)
    return copied.reshape(target)


if __name__ == "__main__":
    key = jax.random.PRNGKey(0)
    # Small NCHW input: batch=2, channels=4, spatial=16x16.
    x = jax.random.normal(key, (2, 4, 16, 16), dtype=jnp.float32)

    # Case 1: default (metadata-only) path — View([4*16*16]) -> (2, 1024).
    y1 = view_forward(x, shape=[4 * 16 * 16], no_batch=False)
    jax.block_until_ready(y1)
    assert y1.shape == (2, 1024)
    assert jnp.allclose(y1, x.reshape(2, 1024))

    # Case 2: default path with no_batch=True — View([8,16,16]) -> (8, 16, 16).
    y2 = view_forward(x, shape=[8, 16, 16], no_batch=True)
    jax.block_until_ready(y2)
    assert y2.shape == (8, 16, 16)
    assert jnp.allclose(y2, x.reshape(8, 16, 16))

    # Case 3: forced physical copy through the tiled Pallas kernel (f32).
    y3 = view_forward(x, shape=[4 * 16 * 16], no_batch=False, force_copy=True)
    jax.block_until_ready(y3)
    assert y3.shape == (2, 1024)
    assert jnp.allclose(y3, x.reshape(2, 1024))

    # Case 4: forced copy on an awkward (non-128-divisible) size — exercises
    # the whole-array single-block path.
    x_odd = jax.random.normal(key, (3, 5, 7), dtype=jnp.float32)
    y4 = view_forward(x_odd, shape=[7, 5, 3], no_batch=True, force_copy=True)
    jax.block_until_ready(y4)
    assert y4.shape == (7, 5, 3)
    assert jnp.allclose(y4, x_odd.reshape(7, 5, 3))

    # Case 5: forced copy on a packed dtype (bf16) — exercises the dtype-aware
    # sublane granularity (16 rows/vreg) on the tiled path.
    x_bf16 = jax.random.normal(key, (8, 3, 32, 32), dtype=jnp.bfloat16)
    y5 = view_forward(x_bf16, shape=[3 * 32 * 32], no_batch=False, force_copy=True)
    jax.block_until_ready(y5)
    assert y5.shape == (8, 3 * 32 * 32)
    assert jnp.array_equal(y5, x_bf16.reshape(8, 3 * 32 * 32))

    print("KERNEL_OK")
</pallas_src>

<mosaic_0001>
module attributes {stable_mosaic.version = 11 : i64} {
  func.func @_copy_kernel(%arg0: i32, %arg1: memref<16x128xf32, #tpu.memory_space<vmem>>, %arg2: memref<16x128xf32, #tpu.memory_space<vmem>>) attributes {dimension_semantics = [#tpu.dimension_semantics<parallel>], iteration_bounds = array<i64: 1>, scalar_prefetch = 0 : i64, scratch_operands = 0 : i64, tpu.core_type = #tpu.core_type<tc>, window_params = [{transform_indices = @transform_0, window_bounds = array<i64: 16, 128>}, {transform_indices = @transform_1, window_bounds = array<i64: 16, 128>}]} {
    %c0 = arith.constant 0 : index
    %c0_0 = arith.constant 0 : index
    %0 = vector.load %arg1[%c0, %c0_0] : memref<16x128xf32, #tpu.memory_space<vmem>>, vector<16x128xf32>
    %c0_1 = arith.constant 0 : index
    %c0_2 = arith.constant 0 : index
    %1 = vector.load %arg2[%c0_1, %c0_2] : memref<16x128xf32, #tpu.memory_space<vmem>>, vector<16x128xf32>
    tpu.vector_store %arg2[%c0_1, %c0_2], %0 {strides = array<i32>} : memref<16x128xf32, #tpu.memory_space<vmem>>, vector<16x128xf32>,
    return
  }
  func.func @transform_0(%arg0: i32) -> (i32, i32) {
    %c0_i32 = arith.constant 0 : i32
    %c0_i32_0 = arith.constant 0 : i32
    return %arg0, %c0_i32 : i32, i32
  }
  func.func @transform_1(%arg0: i32) -> (i32, i32) {
    %c0_i32 = arith.constant 0 : i32
    %c0_i32_0 = arith.constant 0 : i32
    return %arg0, %c0_i32 : i32, i32
  }
}

</mosaic_0001>

<bundles_post_ra>
// kernel: tpu_custom_call.1
= control target key start
LH: loop header
LB: loop body
LE: loop exit
PB: predicated region body
PF: predicated region fallthrough
CT: control target
= control target key end

     0   :  { %6 = vsyncpa [#allocation3], 0  ;;  %s124_s0 = inlined_call_operand.hbm [shape: f32[16,128], index: 0, kind: input, shape index: {}]   ;;  %s125_s1 = inlined_call_operand.hbm [shape: f32[16,128], index: 1, kind: output, shape index: {}]  }
   0x1   :  { %7 = vsyncpa [#allocation4], 0  ;;  %s12_s8 = sshll.u32 %s124_s0, 4  ;;  %s104_s9 = smov [#allocation2]   ;;  %s13_s8 = int_to_ptr.hbm [resolvable:$true] %s12_s8 }
   0x2   :  { %s14_s10 = sshll.u32 %s104_s9, 4  ;;  %s105_s11 = smov 128   ;;  %s15_s10 = int_to_ptr.vmem [resolvable:$true] %s14_s10 }
   0x3   :  { %s106_s12 = smov 8  }
   0x4   :  { %20 = dma.hbm_to_vmem [thread:$0]  %s13_s8, 256, %s15_s10, [#allocation3], %s105_s11, %s105_s11, %s106_s12  }
   0x5   :  { %100 = dma.done.wait [#allocation3], 256  }
   0x6   :  { %101 = vsyncadd [#allocation3], 4294967040  ;;  %s107_s13 = smov [#allocation5]   ;;  %s35_s17 = sshll.u32 %s125_s1, 4  ;;  %v25_v0 = vld [vmem:[#allocation2] sm:$0xff]  ;;  %v26_v1 = vld [vmem:[#allocation2 + $0x8] sm:$0xff]  ;;  %s36_s17 = int_to_ptr.hbm [resolvable:$true] %s35_s17 }
   0x7   :  { %s33_s14 = sshll.u32 %s107_s13, 4  ;;  %27 = vst [vmem:[#allocation5] sm:$0xff] %v25_v0  ;;  %s34_s14 = int_to_ptr.vmem [resolvable:$true] %s33_s14 }
   0x8   :  { %28 = vst [vmem:[#allocation5 + $0x8] sm:$0xff] %v26_v1 }
   0x9   :  { %41 = dma.vmem_to_hbm [thread:$0]  %s34_s14, 256, %s36_s17, [#allocation4], %s105_s11, %s105_s11, %s106_s12  }
   0xa   :  { %102 = dma.done.wait [#allocation4], 256  }
   0xb   :  { %103 = vsyncadd [#allocation4], 4294967040 }
   0xc   :  { %46 = vsyncpa [#allocation3], 1 }
   0xd   :  { %47 = vsyncpa [#allocation4], 1 }

</bundles_post_ra>
